<compile_context>
chip_gen: v7x
topology: tpu7x:2x2x1
jax: 0.10.0
libtpu: 0.0.40
codegen_flags: <defaults>
</compile_context>

<pallas_src>
import jax
import jax.numpy as jnp
from jax.experimental import pallas as pl
from jax.experimental.pallas import tpu as pltpu

_LANES = 128  # lane-dense partial-sum output width (avoids masked vst)


def _round_up(x, m):
    return ((x + m - 1) // m) * m


def _make_ce_ls_kernel(epsilon, num_classes, batch, tile_rows):
    eps = float(epsilon)
    K = int(num_classes)
    B = int(batch)
    TB = int(tile_rows)

    def ce_ls_kernel(x_ref, t_ref, o_ref):
        # x_ref: (TB, K) logits (any float dtype), t_ref: (TB, 1) int32, o_ref: (1, 128) f32
        x = x_ref[...].astype(jnp.float32)                     # cast in-kernel (bf16-friendly DMA)
        t = t_ref[...]                                         # (TB, 1) int32

        # numerically stable log-softmax pieces (f32)
        m = jnp.max(x, axis=1, keepdims=True)                  # (TB, 1)
        shifted = x - m                                        # (TB, K)
        lse = jnp.log(jnp.sum(jnp.exp(shifted), axis=1, keepdims=True))  # (TB, 1)

        # shifted[target] via iota-compare masked reduce (no one-hot materialization)
        col = jax.lax.broadcasted_iota(jnp.int32, shifted.shape, 1)      # (TB, K)
        shifted_at_t = jnp.sum(jnp.where(col == t, shifted, 0.0),
                               axis=1, keepdims=True)                    # (TB, 1) = x[t] - m
        sum_shifted = jnp.sum(shifted, axis=1, keepdims=True)            # (TB, 1) = sum_k x - K*m

        # loss_i = -[(1-eps)*lp[t] + eps*sum_k lp],  lp = shifted - lse
        lp_at_t = shifted_at_t - lse                                     # (TB, 1)
        sum_lp = sum_shifted - jnp.float32(K) * lse                      # (TB, 1)
        per_sample = -((1.0 - eps) * lp_at_t + eps * sum_lp)             # (TB, 1)

        # mask padded rows of the last (partial) batch tile
        row = jax.lax.broadcasted_iota(jnp.int32, per_sample.shape, 0) + pl.program_id(0) * TB
        per_sample = jnp.where(row < B, per_sample, 0.0)

        tile_sum = jnp.sum(per_sample, axis=0, keepdims=True)            # (1, 1)
        o_ref[...] = jnp.broadcast_to(tile_sum, (1, _LANES))             # lane-dense store

    return ce_ls_kernel


def cross_entropy_label_smooth(inputs, targets, epsilon=0.05, tile_rows=None):
    """inputs: (B, K) float (f32 or bf16) logits, targets: (B,) int -> scalar f32 loss."""
    B, K = inputs.shape
    t = targets.astype(jnp.int32).reshape(B, 1)
    itemsize = jnp.dtype(inputs.dtype).itemsize

    if tile_rows is None:
        # ~4 MiB per input buffer (x2 for double buffering) -> well under scoped VMEM on
        # v5e/v6e/v7x even at large K; cap rows so tiny-K cases don't blow up the tile.
        budget_bytes = 4 * 1024 * 1024
        tile_rows = max(8, min(2048, budget_bytes // max(1, K * itemsize)))
    TB = min(_round_up(B, 8), _round_up(int(tile_rows), 8))
    num_tiles = pl.cdiv(B, TB)

    kernel = _make_ce_ls_kernel(epsilon, K, B, TB)

    cost = pl.CostEstimate(
        flops=6 * B * K,
        transcendentals=B * K + B,            # exp per element + log per row
        bytes_accessed=B * K * itemsize + B * 4 + num_tiles * _LANES * 4,
    )

    partials = pl.pallas_call(
        kernel,
        out_shape=jax.ShapeDtypeStruct((num_tiles, _LANES), jnp.float32),
        grid=(num_tiles,),
        in_specs=[
            pl.BlockSpec((TB, K), lambda i: (i, 0)),   # logits tile
            pl.BlockSpec((TB, 1), lambda i: (i, 0)),   # targets tile
        ],
        out_specs=pl.BlockSpec((1, _LANES), lambda i: (i, 0)),
        compiler_params=pltpu.CompilerParams(
            dimension_semantics=("parallel",),          # batch tiles are independent
            vmem_limit_bytes=32 * 1024 * 1024,          # fits v7x's smaller VMEM too
        ),
        cost_estimate=cost,
    )(inputs, t)

    # finish the batch mean with a tiny reduction in the wrapper
    return jnp.sum(partials[:, 0]) / jnp.float32(B)


def _reference(inputs, targets, epsilon=0.05):
    # pure-JAX reference mirroring the PyTorch module
    x = inputs.astype(jnp.float32)
    log_probs = jax.nn.log_softmax(x, axis=1)
    onehot = jax.nn.one_hot(targets, x.shape[1], dtype=jnp.float32)
    smoothed = (1.0 - epsilon) * onehot + epsilon
    return jnp.mean(jnp.sum(-smoothed * log_probs, axis=1))


if __name__ == "__main__":
    key = jax.random.PRNGKey(0)
    k1, k2 = jax.random.split(key)

    # small shapes consistent with the module; B not a multiple of 8 exercises row masking
    B, K = 10, 32
    inputs = jax.random.normal(k1, (B, K), dtype=jnp.float32)
    targets = jax.random.randint(k2, (B,), 0, K, dtype=jnp.int32)

    # f32 path
    loss = cross_entropy_label_smooth(inputs, targets, epsilon=0.05)
    loss = jax.block_until_ready(loss)
    ref = _reference(inputs, targets, epsilon=0.05)
    assert jnp.allclose(loss, ref, atol=1e-4, rtol=1e-4), (loss, ref)

    # bf16 logits path (half the HBM traffic; lse math stays f32 inside the kernel)
    inputs_bf16 = inputs.astype(jnp.bfloat16)
    loss_bf16 = jax.block_until_ready(
        cross_entropy_label_smooth(inputs_bf16, targets, epsilon=0.05))
    ref_bf16 = _reference(inputs_bf16, targets, epsilon=0.05)
    assert jnp.allclose(loss_bf16, ref_bf16, atol=1e-2, rtol=1e-2), (loss_bf16, ref_bf16)

    print("KERNEL_OK")
</pallas_src>

<mosaic_0001>
module attributes {stable_mosaic.version = 11 : i64} {
  func.func @ce_ls_kernel(%arg0: i32, %arg1: memref<16x32xf32, #tpu.memory_space<vmem>>, %arg2: memref<16x1xi32, #tpu.memory_space<vmem>>, %arg3: memref<1x128xf32, #tpu.memory_space<vmem>>) attributes {dimension_semantics = [#tpu.dimension_semantics<parallel>], iteration_bounds = array<i64: 1>, scalar_prefetch = 0 : i64, scratch_operands = 0 : i64, tpu.core_type = #tpu.core_type<tc>, window_params = [{transform_indices = @transform_0, window_bounds = array<i64: 16, 32>}, {transform_indices = @transform_1, window_bounds = array<i64: 16, 1>}, {transform_indices = @transform_2, window_bounds = array<i64: 1, 128>}]} {
    %c0 = arith.constant 0 : index
    %c0_0 = arith.constant 0 : index
    %0 = vector.load %arg1[%c0, %c0_0] : memref<16x32xf32, #tpu.memory_space<vmem>>, vector<16x32xf32>
    %c0_1 = arith.constant 0 : index
    %c0_2 = arith.constant 0 : index
    %1 = vector.load %arg2[%c0_1, %c0_2] : memref<16x1xi32, #tpu.memory_space<vmem>>, vector<16x1xi32>
    %cst = arith.constant dense<0xFF800000> : vector<16xf32>
    %2 = vector.multi_reduction <maximumf>, %0, %cst [1] : vector<16x32xf32> to vector<16xf32>
    %3 = vector.shape_cast %2 : vector<16xf32> to vector<16x1xf32>
    %4 = vector.broadcast %3 : vector<16x1xf32> to vector<16x32xf32>
    %5 = arith.subf %0, %4 : vector<16x32xf32>
    %6 = math.exp %5 : vector<16x32xf32>
    %cst_3 = arith.constant dense<0.000000e+00> : vector<16xf32>
    %7 = vector.multi_reduction <add>, %6, %cst_3 [1] : vector<16x32xf32> to vector<16xf32>
    %8 = vector.shape_cast %7 : vector<16xf32> to vector<16x1xf32>
    %9 = math.log %8 : vector<16x1xf32>
    %10 = tpu.iota {dimensions = array<i32: 1>} : vector<16x32xi32>
    %11 = vector.broadcast %1 : vector<16x1xi32> to vector<16x32xi32>
    %12 = arith.cmpi eq, %10, %11 : vector<16x32xi32>
    %cst_4 = arith.constant 0.000000e+00 : f32
    %13 = vector.broadcast %cst_4 : f32 to vector<16x32xf32>
    %14 = arith.select %12, %5, %13 : vector<16x32xi1>, vector<16x32xf32>
    %cst_5 = arith.constant dense<0.000000e+00> : vector<16xf32>
    %15 = vector.multi_reduction <add>, %14, %cst_5 [1] : vector<16x32xf32> to vector<16xf32>
    %16 = vector.shape_cast %15 : vector<16xf32> to vector<16x1xf32>
    %cst_6 = arith.constant dense<0.000000e+00> : vector<16xf32>
    %17 = vector.multi_reduction <add>, %5, %cst_6 [1] : vector<16x32xf32> to vector<16xf32>
    %18 = vector.shape_cast %17 : vector<16xf32> to vector<16x1xf32>
    %19 = arith.subf %16, %9 : vector<16x1xf32>
    %cst_7 = arith.constant 3.200000e+01 : f32
    %20 = vector.broadcast %cst_7 : f32 to vector<16x1xf32>
    %21 = arith.mulf %20, %9 : vector<16x1xf32>
    %22 = arith.subf %18, %21 : vector<16x1xf32>
    %cst_8 = arith.constant 0.949999988 : f32
    %23 = vector.broadcast %cst_8 : f32 to vector<16x1xf32>
    %24 = arith.mulf %23, %19 : vector<16x1xf32>
    %cst_9 = arith.constant 5.000000e-02 : f32
    %25 = vector.broadcast %cst_9 : f32 to vector<16x1xf32>
    %26 = arith.mulf %25, %22 : vector<16x1xf32>
    %27 = arith.addf %24, %26 : vector<16x1xf32>
    %cst_10 = arith.constant 0.000000e+00 : f32
    %28 = vector.broadcast %cst_10 : f32 to vector<16x1xf32>
    %29 = arith.subf %28, %27 : vector<16x1xf32>
    %30 = tpu.iota {dimensions = array<i32: 0>} : vector<16x1xi32>
    %c16_i32 = arith.constant 16 : i32
    %31 = arith.muli %arg0, %c16_i32 : i32
    %32 = vector.broadcast %31 : i32 to vector<16x1xi32>
    %33 = arith.addi %30, %32 : vector<16x1xi32>
    %c10_i32 = arith.constant 10 : i32
    %34 = vector.broadcast %c10_i32 : i32 to vector<16x1xi32>
    %35 = arith.cmpi slt, %33, %34 : vector<16x1xi32>
    %cst_11 = arith.constant 0.000000e+00 : f32
    %36 = vector.broadcast %cst_11 : f32 to vector<16x1xf32>
    %37 = arith.select %35, %29, %36 : vector<16x1xi1>, vector<16x1xf32>
    %cst_12 = arith.constant dense<0.000000e+00> : vector<1xf32>
    %38 = vector.multi_reduction <add>, %37, %cst_12 [0] : vector<16x1xf32> to vector<1xf32>
    %39 = vector.shape_cast %38 : vector<1xf32> to vector<1x1xf32>
    %40 = vector.shape_cast %39 : vector<1x1xf32> to vector<1x1xf32>
    %41 = vector.broadcast %40 : vector<1x1xf32> to vector<1x128xf32>
    %c0_13 = arith.constant 0 : index
    %c0_14 = arith.constant 0 : index
    %42 = vector.load %arg3[%c0_13, %c0_14] : memref<1x128xf32, #tpu.memory_space<vmem>>, vector<1x128xf32>
    tpu.vector_store %arg3[%c0_13, %c0_14], %41 {strides = array<i32>} : memref<1x128xf32, #tpu.memory_space<vmem>>, vector<1x128xf32>,
    return
  }
  func.func @transform_0(%arg0: i32) -> (i32, i32) {
    %c0_i32 = arith.constant 0 : i32
    %c0_i32_0 = arith.constant 0 : i32
    return %arg0, %c0_i32 : i32, i32
  }
  func.func @transform_1(%arg0: i32) -> (i32, i32) {
    %c0_i32 = arith.constant 0 : i32
    %c0_i32_0 = arith.constant 0 : i32
    return %arg0, %c0_i32 : i32, i32
  }
  func.func @transform_2(%arg0: i32) -> (i32, i32) {
    %c0_i32 = arith.constant 0 : i32
    %c0_i32_0 = arith.constant 0 : i32
    return %arg0, %c0_i32 : i32, i32
  }
}

</mosaic_0001>

<bundles_post_ra>
// kernel: tpu_custom_call.1
= control target key start
LH: loop header
LB: loop body
LE: loop exit
PB: predicated region body
PF: predicated region fallthrough
CT: control target
= control target key end

     0   :  { %vm16_vm0 = vcmask 261120   ;;  %v146_v4 = vmov 0   ;;  %s195_s0 = inlined_call_operand.vmem [shape: f32[10,32], index: 0, kind: input, shape index: {}]   ;;  %s196_s1 = inlined_call_operand.vmem [shape: s32[10,1], index: 1, kind: input, shape index: {}]   ;;  %s197_s2 = inlined_call_operand.hbm [shape: f32[1,128], index: 2, kind: output, shape index: {}]  }
   0x1   :  { %v13_v0 = vld [vmem:[%s195_s0 + $0x8] sm:$0xff]  ;;  %v12_v1 = vld [vmem:[%s195_s0] sm:$0xff]  ;;  %112 = vset.pattern.permute.xlu1 %v146_v4  ;;  %113 = vset.pattern.permute.xlu0 %v146_v4 }
   0x2   :  { %v15_v2 = vld [vmem:[%s196_s1 + $0x8] sm:$0xff]  ;;  %v20_v3 = vsel %vm16_vm0, %v13_v0, -inf }
   0x3   :  { %7 = vsyncpa [#allocation3], 0  ;;  %21 = vmax.xlane.f32.xlu0 %v20_v3  ;;  %45 = vperm.xlu1 %112, %v15_v2   ;;  %v17_v5 = vsel %vm16_vm0, %v12_v1, -inf  ;;  %v14_v6 = vld [vmem:[%s196_s1] sm:$0xff]  ;;  %v39_v12 = vlaneseq  ;;  %s147_s0 = smov [#allocation2]  }
   0x4   :  { %s102_s1 = sshll.u32 %s147_s0, 4  ;;  %s103_s1 = int_to_ptr.vmem [resolvable:$true] %s102_s1 }
   0x5   :  { %v40_v14 = vand.u32 127, %v39_v12  ;;  %v78_v37 = vshrl.u32 %v39_v12, 7  ;;  %s122_s17 = scalar_lea.vmem %s103_s1, 16  ;;  %s126_s18 = scalar_lea.vmem %s103_s1, 32 }
   0x6   :  { %p123_p0 = scmp.ne.s32.totalorder %s103_s1, %s122_s17  ;;  %p127_p1 = scmp.lt.s32.totalorder %s103_s1, %s103_s1 }
   0x7   :  { %18 = vmax.xlane.f32.xlu0 %v17_v5  ;;  %42 = vperm.xlu1 %112, %v14_v6   ;;  %v79_v45 = vadd.s32 8, %v78_v37  ;;  %p128_p2 = scmp.lt.s32.totalorder %s126_s18, %s122_s17 }
   0x9   :  { %vm85_vm3 = vcmp.lt.s32.totalorder %v79_v45, 10  ;;  %p129_p3 = por %p128_p2, %p127_p1 }
   0xb   :  { %p130_p4 = pnand %p129_p3, %p123_p0 }
  0x82   :  { %v46_v15 = vpop.permute.xlu1 %45 }
  0x83   :  { %vm48_vm1 = vcmp.eq.s32.totalorder %v40_v14, %v46_v15 }
  0x86   :  { %v43_v20 = vpop.permute.xlu1 %42 }
  0x87   :  { %vm47_vm2 = vcmp.eq.s32.totalorder %v40_v14, %v43_v20 }
  0x90   :  { %v22_v7 = vpop.xlane.xlu0 %21 }
  0x91   :  { %v24_v8 = vsub.f32 %v13_v0, %v22_v7 }
  0x93   :  { %v27_v9 = vmul.f32 1.442695, %v24_v8  ;;  %v50_v18 = vsel %vm48_vm1, %v24_v8, 0.0  ;;  %v60_v23 = vsel %vm16_vm0, %v24_v8, 0.0 }
  0x94   :  { %v19_v10 = vpop.xlane.xlu0 %18  ;;  %v54_v21 = vsel %vm16_vm0, %v50_v18, 0.0 }
  0x95   :  { %114 = vpow2.f32 %v27_v9  ;;  %v23_v11 = vsub.f32 %v12_v1, %v19_v10 }
  0x97   :  { %v25_v13 = vmul.f32 1.442695, %v23_v11  ;;  %v49_v24 = vsel %vm47_vm2, %v23_v11, 0.0  ;;  %v57_v26 = vsel %vm16_vm0, %v23_v11, 0.0 }
  0x98   :  { %v51_v25 = vsel %vm16_vm0, %v49_v24, 0.0 }
  0x99   :  { %116 = vpow2.f32 %v25_v13 }
  0x9f   :  { %v115_v16 = vpop.eup %114 }
  0xa0   :  { %v32_v17 = vsel %vm16_vm0, %v115_v16, 0.0 }
  0xa1   :  { %33 = vadd.xlane.f32.xlu0 %v32_v17 }
  0xa3   :  { %v117_v19 = vpop.eup %116 }
  0xa4   :  { %v29_v22 = vsel %vm16_vm0, %v117_v19, 0.0 }
  0xa5   :  { %55 = vadd.xlane.f32.xlu0 %v54_v21  ;;  %30 = vadd.xlane.f32.xlu1 %v29_v22 }
  0xa9   :  { %61 = vadd.xlane.f32.xlu0 %v60_v23 }
  0xad   :  { %52 = vadd.xlane.f32.xlu0 %v51_v25 }
  0xb1   :  { %58 = vadd.xlane.f32.xlu0 %v57_v26 }
 0x12e   :  { %v34_v27 = vpop.xlane.xlu0 %33 }
 0x12f   :  { %118 = vlog2.f32 %v34_v27 }
 0x132   :  { %v31_v28 = vpop.xlane.xlu1 %30  ;;  %v56_v29 = vpop.xlane.xlu0 %55 }
 0x133   :  { %120 = vlog2.f32 %v31_v28 }
 0x136   :  { %v62_v30 = vpop.xlane.xlu0 %61 }
 0x139   :  { %v119_v31 = vpop.eup %118 }
 0x13a   :  { %v38_v32 = vmul.f32 0.6931472, %v119_v31  ;;  %v53_v33 = vpop.xlane.xlu0 %52 }
 0x13c   :  { %v64_v34 = vsub.f32 %v56_v29, %v38_v32  ;;  %v66_v35 = vmul.f32 32.0, %v38_v32 }
 0x13d   :  { %v121_v36 = vpop.eup %120 }
 0x13e   :  { %v68_v38 = vsub.f32 %v62_v30, %v66_v35  ;;  %v36_v39 = vmul.f32 0.6931472, %v121_v36  ;;  %v70_v40 = vmul.f32 0.95, %v64_v34  ;;  %v59_v44 = vpop.xlane.xlu0 %58 }
 0x140   :  { %v72_v41 = vmul.f32 0.05, %v68_v38  ;;  %v63_v42 = vsub.f32 %v53_v33, %v36_v39  ;;  %v65_v43 = vmul.f32 32.0, %v36_v39 }
 0x142   :  { %v74_v46 = vadd.f32 %v72_v41, %v70_v40  ;;  %v67_v47 = vsub.f32 %v59_v44, %v65_v43  ;;  %v69_v48 = vmul.f32 0.95, %v63_v42 }
 0x144   :  { %v71_v49 = vmul.f32 0.05, %v67_v47  ;;  %v76_v50 = vsub.f32 0.0, %v74_v46 }
 0x146   :  { %v73_v51 = vadd.f32 %v71_v49, %v69_v48  ;;  %v87_v53 = vsel %vm85_vm3, %v76_v50, 0.0 }
 0x148   :  { %v75_v52 = vsub.f32 0.0, %v73_v51 }
 0x14a   :  { %v88_v54 = vadd.f32 %v87_v53, %v75_v52 }
 0x14c   :  { %v89_v55 = vrot.slane %v88_v54, 4 }
 0x14e   :  { %v90_v56 = vadd.f32 %v89_v55, %v88_v54 }
 0x150   :  { %v91_v57 = vrot.slane %v90_v56, 2 }
 0x152   :  { %v92_v58 = vadd.f32 %v91_v57, %v90_v56 }
 0x154   :  { %v93_v59 = vrot.slane %v92_v58, 1 }
 0x156   :  { %v94_v60 = vadd.f32 %v93_v59, %v92_v58 }
 0x158   :  { %95 = vst [vmem:[#allocation2] sm:$0x1] %v94_v60 }
 0x159   :  { %133 = shalt.err (!%p130_p4)
}
 0x15a   :  { %s134_s21 = scalar_lea.hbm %s197_s2, 16 }
 0x15b   :  { %p135_p5 = scmp.ne.s32.totalorder %s197_s2, %s134_s21  ;;  %p138_p6 = scmp.lt.u32.totalorder %s134_s21, %s197_s2 }
 0x15d   :  { %p140_p7 = pnand %p138_p6, %p135_p5 }
 0x15f   :  { %143 = shalt.err (!%p140_p7)
}
 0x160   :  { %105 = dma.vmem_to_hbm [thread:$0]  %s103_s1, 16, %s197_s2, [#allocation3]  }
 0x161   :  { %144 = dma.done.wait [#allocation3], 16  }
 0x162   :  { %145 = vsyncadd [#allocation3], 4294967280 }
 0x163   :  { %109 = vsyncpa [#allocation3], 1 }

</bundles_post_ra>
